<compile_context>
chip_gen: v5e
topology: v5e:2x2
jax: 0.10.0
libtpu: 0.0.40
codegen_flags: <defaults>
</compile_context>

<pallas_src>
import functools

import jax
import jax.numpy as jnp
from jax import lax
from jax.experimental import pallas as pl
from jax.experimental.pallas import tpu as pltpu


def _round_up(x, m):
    return ((x + m - 1) // m) * m


def _vmem_capacity_bytes():
    """Physical VMEM of the local TPU generation; conservative fallback."""
    try:
        info = pltpu.get_tpu_info()
        cap = getattr(info, "vmem_capacity_bytes", None)
        if cap:
            return int(cap)
    except Exception:  # non-TPU backend / API drift — fall through
        pass
    return 64 * 1024 * 1024  # v7x-safe default


def _unpack_params(p_ref):
    p = p_ref[...].astype(jnp.float32)          # (C, 3)
    return p[:, 0:1], p[:, 1:2], p[:, 2:3]      # alpha, gamma, beta: (C, 1)


def _gate_from_spatial_sum(s, alpha, gamma, beta, *, epsilon, mode):
    """s: (C, 1) f32 spatial sum (sum of squares for l2, L1 sum for l1)."""
    if mode == "l2":
        embedding = jnp.sqrt(s + epsilon) * alpha
        mean_c = jnp.mean(embedding * embedding, axis=0, keepdims=True)
        norm = gamma / jnp.sqrt(mean_c + epsilon)
    else:  # "l1"
        embedding = s * alpha
        mean_c = jnp.mean(jnp.abs(embedding), axis=0, keepdims=True)
        norm = gamma / (mean_c + epsilon)
    return 1.0 + jnp.tanh(embedding * norm + beta)   # (C, 1) f32


# ---------------------------------------------------------------------------
# Path 1: resident-block kernel — whole unpadded (C, HW) slab per grid step.
# ---------------------------------------------------------------------------
def _gct_resident_kernel(x_ref, p_ref, o_ref, *, epsilon, mode, after_relu):
    x = x_ref[0]                                    # (C, HW), native dtype
    alpha, gamma, beta = _unpack_params(p_ref)

    xf = x.astype(jnp.float32)
    if mode == "l2":
        s = jnp.sum(xf * xf, axis=-1, keepdims=True)           # (C, 1)
    else:
        red = xf if after_relu else jnp.abs(xf)
        s = jnp.sum(red, axis=-1, keepdims=True)

    gate = _gate_from_spatial_sum(s, alpha, gamma, beta,
                                  epsilon=epsilon, mode=mode)
    # Gating multiply in native dtype (no full f32 copy on the store path).
    o_ref[0] = x * gate.astype(o_ref.dtype)


# ---------------------------------------------------------------------------
# Path 2: fused HW-tiled kernel.  grid = (N, 2*n_t):
#   t <  n_t : accumulate spatial sum of tile t into (C, 128) VMEM scratch
#   t == n_t-1: finalize the per-channel gate into (C, 1) VMEM scratch
#   t >= n_t : apply the gate to tile (t - n_t)
# ---------------------------------------------------------------------------
def _gct_fused_tiled_kernel(x_ref, p_ref, o_ref, acc_ref, gate_ref, *,
                            epsilon, mode, after_relu, n_t, tile, hw):
    t = pl.program_id(1)
    c = acc_ref.shape[0]
    n_chunks = tile // 128
    needs_mask = (hw % tile) != 0   # only the last tile can have a ragged tail

    @pl.when(t == 0)
    def _():
        acc_ref[...] = jnp.zeros_like(acc_ref)

    # ---- Phase 0: accumulate this tile's spatial sum with VPU adds only ----
    @pl.when(t < n_t)
    def _():
        col_base = t * tile
        lane = lax.broadcasted_iota(jnp.int32, (c, 128), 1) if needs_mask else None

        def body(j, carry):
            start = pl.multiple_of(j * 128, 128)
            v = x_ref[0, :, pl.ds(start, 128)].astype(jnp.float32)
            if mode == "l2":
                v = v * v
            elif not after_relu:
                v = jnp.abs(v)
            if needs_mask:
                col = lane + (col_base + j * 128)
                v = jnp.where(col < hw, v, 0.0)
            acc_ref[...] += v
            return carry

        lax.fori_loop(0, n_chunks, body, 0, unroll=(n_chunks <= 8))

    # ---- Finalize gate (single cross-lane reduce) on the last reduce tile ----
    @pl.when(t == n_t - 1)
    def _():
        s = jnp.sum(acc_ref[...], axis=-1, keepdims=True)      # (C, 1)
        alpha, gamma, beta = _unpack_params(p_ref)
        gate_ref[...] = _gate_from_spatial_sum(s, alpha, gamma, beta,
                                               epsilon=epsilon, mode=mode)

    # ---- Phase 1: apply the gate (gate stays resident in VMEM) ----
    @pl.when(t >= n_t)
    def _():
        o_ref[0] = x_ref[0] * gate_ref[...].astype(o_ref.dtype)


# ---------------------------------------------------------------------------
# Wrapper
# ---------------------------------------------------------------------------
def gct_forward(x_nchw, alpha, gamma, beta, *, epsilon=1e-5, mode="l2",
                after_relu=False, hw_tile=None):
    """x_nchw: (N, C, H, W); alpha/gamma/beta: (1, C, 1, 1) (PyTorch shapes).

    hw_tile: if given, forces the fused HW-tiled path with this tile size
    (rounded up to a multiple of 128).  Otherwise the path is chosen from a
    generation-aware VMEM budget.
    """
    if mode not in ("l2", "l1"):
        raise ValueError("Unknown mode!")

    N, C, H, W = x_nchw.shape
    HW = H * W
    dtype = x_nchw.dtype
    itemsize = jnp.dtype(dtype).itemsize

    x = x_nchw.reshape(N, C, HW)     # metadata-only reshape, no HBM traffic

    # Pack alpha/gamma/beta into one small block-resident (C, 3) array.
    params = jnp.stack([alpha.reshape(C), gamma.reshape(C), beta.reshape(C)],
                       axis=1).astype(jnp.float32)

    cap = _vmem_capacity_bytes()
    budget = int(0.70 * cap)

    # Resident working set: double-buffered in/out blocks (native dtype) plus
    # the f32 temporaries from the cast / square inside the reduction.
    block_native = C * HW * itemsize
    f32_tmps = C * HW * 4 * (2 if dtype != jnp.float32 else 1)
    resident_workset = 4 * block_native + f32_tmps + (1 << 20)
    use_resident = (hw_tile is None) and (resident_workset <= budget)

    if use_resident:
        kernel = functools.partial(_gct_resident_kernel, epsilon=epsilon,
                                   mode=mode, after_relu=after_relu)
        vmem_limit = int(min(max(resident_workset + (4 << 20), 32 << 20),
                             int(0.9 * cap)))
        out = pl.pallas_call(
            kernel,
            out_shape=jax.ShapeDtypeStruct((N, C, HW), dtype),
            grid_spec=pltpu.PrefetchScalarGridSpec(
                num_scalar_prefetch=0,
                grid=(N,),
                in_specs=[
                    pl.BlockSpec((1, C, HW), lambda n: (n, 0, 0)),
                    pl.BlockSpec((C, 3), lambda n: (0, 0)),
                ],
                out_specs=pl.BlockSpec((1, C, HW), lambda n: (n, 0, 0)),
            ),
            compiler_params=pltpu.CompilerParams(
                dimension_semantics=("parallel",),
                vmem_limit_bytes=vmem_limit),
        )(x, params)
        return out.reshape(N, C, H, W)

    # ---- fused HW-tiled path (2R + 1W, single pallas_call) ----
    if hw_tile is not None:
        T = max(128, _round_up(int(hw_tile), 128))
    else:
        # ~5x native tile bytes (2x in + 2x out double buffers + temps).
        t_budget = max(128, ((budget - (2 << 20)) // (5 * C * itemsize))
                       // 128 * 128)
        t_budget = min(t_budget, _round_up(HW, 128))
        # Minimize trailing waste: fix the tile count first, then shrink T.
        n_fix = pl.cdiv(HW, t_budget)
        T = max(128, _round_up(pl.cdiv(HW, n_fix), 128))
    n_t = pl.cdiv(HW, T)

    tile_workset = 5 * C * T * itemsize + C * 128 * 4 + (2 << 20)
    vmem_limit = int(min(max(tile_workset + (4 << 20), 32 << 20),
                         int(0.9 * cap)))

    kernel = functools.partial(_gct_fused_tiled_kernel, epsilon=epsilon,
                               mode=mode, after_relu=after_relu,
                               n_t=n_t, tile=T, hw=HW)
    out = pl.pallas_call(
        kernel,
        out_shape=jax.ShapeDtypeStruct((N, C, HW), dtype),
        grid_spec=pltpu.PrefetchScalarGridSpec(
            num_scalar_prefetch=0,
            grid=(N, 2 * n_t),
            in_specs=[
                pl.BlockSpec((1, C, T), lambda n, t: (n, 0, t % n_t)),
                pl.BlockSpec((C, 3), lambda n, t: (0, 0)),
            ],
            out_specs=pl.BlockSpec(
                (1, C, T), lambda n, t: (n, 0, jnp.maximum(t - n_t, 0))),
            scratch_shapes=[
                pltpu.VMEM((C, 128), jnp.float32),   # spatial-sum accumulator
                pltpu.VMEM((C, 1), jnp.float32),     # finalized per-channel gate
            ],
        ),
        compiler_params=pltpu.CompilerParams(
            dimension_semantics=("parallel", "arbitrary"),
            vmem_limit_bytes=vmem_limit),
    )(x, params)
    return out.reshape(N, C, H, W)


# ---------------------------------------------------------------------------
# Plain-JAX reference (transcription of the PyTorch forward) for verification.
# ---------------------------------------------------------------------------
def gct_reference(x, alpha, gamma, beta, *, epsilon=1e-5, mode="l2",
                  after_relu=False):
    xf = x.astype(jnp.float32)
    if mode == "l2":
        embedding = jnp.sqrt(jnp.sum(xf ** 2, axis=(2, 3), keepdims=True)
                             + epsilon) * alpha
        norm = gamma / jnp.sqrt(jnp.mean(embedding ** 2, axis=1, keepdims=True)
                                + epsilon)
    elif mode == "l1":
        _x = xf if after_relu else jnp.abs(xf)
        embedding = jnp.sum(_x, axis=(2, 3), keepdims=True) * alpha
        norm = gamma / (jnp.mean(jnp.abs(embedding), axis=1, keepdims=True)
                        + epsilon)
    else:
        raise ValueError("Unknown mode!")
    gate = 1.0 + jnp.tanh(embedding * norm + beta)
    return (xf * gate).astype(x.dtype)


if __name__ == "__main__":
    key = jax.random.PRNGKey(0)
    N, C, H, W = 2, 4, 16, 16

    kx, kg, kb = jax.random.split(key, 3)
    x = jax.random.normal(kx, (N, C, H, W), dtype=jnp.float32)

    # Parameter shapes from GCT.__init__: (1, C, 1, 1); PyTorch init is
    # alpha=1, gamma=0, beta=0 (identity gate), so perturb gamma/beta to
    # exercise the gating path.
    alpha = jnp.ones((1, C, 1, 1), dtype=jnp.float32)
    gamma = 0.5 * jax.random.normal(kg, (1, C, 1, 1), dtype=jnp.float32)
    beta = 0.1 * jax.random.normal(kb, (1, C, 1, 1), dtype=jnp.float32)

    ref = gct_reference(x, alpha, gamma, beta, epsilon=1e-5, mode="l2")

    # 1) resident-block path, l2 mode (no padding, full-dim blocks)
    out = jax.block_until_ready(
        gct_forward(x, alpha, gamma, beta, epsilon=1e-5, mode="l2"))
    assert out.shape == (N, C, H, W)
    assert jnp.allclose(out, ref, atol=1e-5, rtol=1e-5), "l2 resident mismatch"

    # 2) forced fused HW-tiled path, l2 mode
    out_t = jax.block_until_ready(
        gct_forward(x, alpha, gamma, beta, epsilon=1e-5, mode="l2",
                    hw_tile=128))
    assert jnp.allclose(out_t, ref, atol=1e-5, rtol=1e-5), "l2 tiled mismatch"

    # 3) l1 mode, both paths
    ref_l1 = gct_reference(x, alpha, gamma, beta, epsilon=1e-5, mode="l1",
                           after_relu=False)
    out_l1 = jax.block_until_ready(
        gct_forward(x, alpha, gamma, beta, epsilon=1e-5, mode="l1",
                    after_relu=False))
    assert jnp.allclose(out_l1, ref_l1, atol=1e-5, rtol=1e-5), "l1 mismatch"
    out_l1t = jax.block_until_ready(
        gct_forward(x, alpha, gamma, beta, epsilon=1e-5, mode="l1",
                    after_relu=False, hw_tile=128))
    assert jnp.allclose(out_l1t, ref_l1, atol=1e-5, rtol=1e-5), "l1 tiled mismatch"

    # 4) ragged spatial extent (HW=100): unpadded full-dim resident block and
    #    masked ragged tail in the tiled path.
    xr = jax.random.normal(kx, (N, C, 10, 10), dtype=jnp.float32)
    ref_r = gct_reference(xr, alpha, gamma, beta, epsilon=1e-5, mode="l2")
    out_r = jax.block_until_ready(
        gct_forward(xr, alpha, gamma, beta, epsilon=1e-5, mode="l2"))
    assert jnp.allclose(out_r, ref_r, atol=1e-5, rtol=1e-5), "ragged resident mismatch"
    out_rt = jax.block_until_ready(
        gct_forward(xr, alpha, gamma, beta, epsilon=1e-5, mode="l2",
                    hw_tile=128))
    assert jnp.allclose(out_rt, ref_r, atol=1e-5, rtol=1e-5), "ragged tiled mismatch"

    # 5) bf16 input: native-dtype gating multiply (documented precision deviation)
    xb = x.astype(jnp.bfloat16)
    out_b = jax.block_until_ready(
        gct_forward(xb, alpha, gamma, beta, epsilon=1e-5, mode="l2"))
    ref_b = gct_reference(xb, alpha, gamma, beta, epsilon=1e-5, mode="l2")
    assert out_b.dtype == jnp.bfloat16
    assert jnp.allclose(out_b.astype(jnp.float32), ref_b.astype(jnp.float32),
                        atol=5e-2, rtol=5e-2), "bf16 mismatch"

    print("KERNEL_OK")
</pallas_src>

<mosaic_0001>
module attributes {stable_mosaic.version = 11 : i64} {
  func.func @_gct_resident_kernel(%arg0: i32, %arg1: memref<1x4x256xf32, #tpu.memory_space<vmem>>, %arg2: memref<4x3xf32, #tpu.memory_space<vmem>>, %arg3: memref<1x4x256xf32, #tpu.memory_space<vmem>>) attributes {dimension_semantics = [#tpu.dimension_semantics<parallel>], iteration_bounds = array<i64: 2>, scalar_prefetch = 0 : i64, scratch_operands = 0 : i64, tpu.core_type = #tpu.core_type<tc>, window_params = [{transform_indices = @transform_0, window_bounds = array<i64: 1, 4, 256>}, {pipeline_mode = #tpu.pipeline_mode<synchronous>, transform_indices = @transform_1, window_bounds = array<i64: 4, 3>}, {transform_indices = @transform_2, window_bounds = array<i64: 1, 4, 256>}]} {
    %c0 = arith.constant 0 : index
    %c0_0 = arith.constant 0 : index
    %c0_1 = arith.constant 0 : index
    %0 = vector.load %arg1[%c0, %c0_0, %c0_1] : memref<1x4x256xf32, #tpu.memory_space<vmem>>, vector<1x4x256xf32>
    %1 = vector.shape_cast %0 : vector<1x4x256xf32> to vector<4x256xf32>
    %c0_2 = arith.constant 0 : index
    %c0_3 = arith.constant 0 : index
    %2 = vector.load %arg2[%c0_2, %c0_3] : memref<4x3xf32, #tpu.memory_space<vmem>>, vector<4x3xf32>
    %3 = vector.extract_strided_slice %2 {offsets = [0, 0], sizes = [4, 1], strides = [1, 1]} : vector<4x3xf32> to vector<4x1xf32>
    %4 = vector.extract_strided_slice %2 {offsets = [0, 1], sizes = [4, 1], strides = [1, 1]} : vector<4x3xf32> to vector<4x1xf32>
    %5 = vector.extract_strided_slice %2 {offsets = [0, 2], sizes = [4, 1], strides = [1, 1]} : vector<4x3xf32> to vector<4x1xf32>
    %6 = arith.mulf %1, %1 : vector<4x256xf32>
    %cst = arith.constant dense<0.000000e+00> : vector<4xf32>
    %7 = vector.multi_reduction <add>, %6, %cst [1] : vector<4x256xf32> to vector<4xf32>
    %8 = vector.shape_cast %7 : vector<4xf32> to vector<4x1xf32>
    %cst_4 = arith.constant 9.99999974E-6 : f32
    %9 = vector.broadcast %cst_4 : f32 to vector<4x1xf32>
    %10 = arith.addf %8, %9 : vector<4x1xf32>
    %11 = math.sqrt %10 : vector<4x1xf32>
    %12 = arith.mulf %11, %3 : vector<4x1xf32>
    %13 = arith.mulf %12, %12 : vector<4x1xf32>
    %cst_5 = arith.constant dense<0.000000e+00> : vector<1xf32>
    %14 = vector.multi_reduction <add>, %13, %cst_5 [0] : vector<4x1xf32> to vector<1xf32>
    %15 = vector.shape_cast %14 : vector<1xf32> to vector<1x1xf32>
    %cst_6 = arith.constant 4.000000e+00 : f32
    %16 = vector.broadcast %cst_6 : f32 to vector<1x1xf32>
    %17 = arith.divf %15, %16 : vector<1x1xf32>
    %cst_7 = arith.constant 9.99999974E-6 : f32
    %18 = vector.broadcast %cst_7 : f32 to vector<1x1xf32>
    %19 = arith.addf %17, %18 : vector<1x1xf32>
    %20 = math.sqrt %19 : vector<1x1xf32>
    %21 = vector.broadcast %20 : vector<1x1xf32> to vector<4x1xf32>
    %22 = arith.divf %4, %21 : vector<4x1xf32>
    %23 = arith.mulf %12, %22 : vector<4x1xf32>
    %24 = arith.addf %23, %5 : vector<4x1xf32>
    %25 = math.tanh %24 : vector<4x1xf32>
    %cst_8 = arith.constant 1.000000e+00 : f32
    %26 = vector.broadcast %cst_8 : f32 to vector<4x1xf32>
    %27 = arith.addf %26, %25 : vector<4x1xf32>
    %28 = vector.broadcast %27 : vector<4x1xf32> to vector<4x256xf32>
    %29 = arith.mulf %1, %28 : vector<4x256xf32>
    %c0_9 = arith.constant 0 : index
    %c0_10 = arith.constant 0 : index
    %c0_11 = arith.constant 0 : index
    %30 = vector.load %arg3[%c0_9, %c0_10, %c0_11] : memref<1x4x256xf32, #tpu.memory_space<vmem>>, vector<1x4x256xf32>
    %31 = vector.shape_cast %30 : vector<1x4x256xf32> to vector<4x256xf32>
    %32 = vector.shape_cast %29 : vector<4x256xf32> to vector<1x4x256xf32>
    tpu.vector_store %arg3[%c0_9, %c0_10, %c0_11], %32 {strides = array<i32>} : memref<1x4x256xf32, #tpu.memory_space<vmem>>, vector<1x4x256xf32>,
    return
  }
  func.func @transform_0(%arg0: i32) -> (i32, i32, i32) {
    %c0_i32 = arith.constant 0 : i32
    %c0_i32_0 = arith.constant 0 : i32
    %c0_i32_1 = arith.constant 0 : i32
    return %arg0, %c0_i32, %c0_i32_0 : i32, i32, i32
  }
  func.func @transform_1(%arg0: i32) -> (i32, i32) {
    %c0_i32 = arith.constant 0 : i32
    %c0_i32_0 = arith.constant 0 : i32
    %c0_i32_1 = arith.constant 0 : i32
    return %c0_i32, %c0_i32_0 : i32, i32
  }
  func.func @transform_2(%arg0: i32) -> (i32, i32, i32) {
    %c0_i32 = arith.constant 0 : i32
    %c0_i32_0 = arith.constant 0 : i32
    %c0_i32_1 = arith.constant 0 : i32
    return %arg0, %c0_i32, %c0_i32_0 : i32, i32, i32
  }
}

</mosaic_0001>

<bundles_post_ra>
// kernel: tpu_custom_call.1
= control target key start
LH: loop header
LB: loop body
LE: loop exit
PB: predicated region body
PF: predicated region fallthrough
CT: control target
= control target key end

     0   :  { %7 = vsyncpa [#allocation3], 0  ;;  %s769_s0 = inlined_call_operand.hbm [shape: f32[2,4,256], index: 0, kind: input, shape index: {}]   ;;  %s770_s1 = inlined_call_operand.hbm [shape: f32[4,3], index: 1, kind: input, shape index: {}]   ;;  %s771_s2 = inlined_call_operand.hbm [shape: f32[2,4,256], index: 2, kind: output, shape index: {}]  }
   0x1   :  { %9 = vsyncpa [#allocation3 + $0x1], 0 }
   0x2   :  { %10 = vsyncpa [#allocation6], 0 }
   0x3   :  { %11 = vsyncpa [#allocation4], 0 }
   0x4   :  { %13 = vsyncpa [#allocation4 + $0x1], 0  ;;  %s622_s9 = smov 0   ;;  %s624_s10 = smov 0  }
   0x5   :  { %s626_s11 = smov 0   ;;  %s628_s12 = smov 0  }
   0x6 LB: > { %s643_s13 = sadd.s32 4294967295, %s598_s12   ;;  %s375_s14 = sadd.s32 4294967294, %s598_s12   ;;  %s598_s12 = sphi %s628_s12, %s781_s12   ;;  %s594_s11 = sphi %s626_s11, %s780_s11   ;;  %s590_s10 = sphi %s624_s10, %s779_s10   ;;  %s586_s9 = sphi %s622_s9, %s778_s9  }
   0x7   : > { %p39_p0 = scmp.ne.s32.totalorder %s590_s10, %s586_s9  ;;  %p40_p1 = scmp.eq.s32.totalorder %s643_s13, 0 }
   0x8   : > { %p84_p2 = scmp.eq.s32.totalorder %s643_s13, 1  ;;  %p90_p3 = scmp.eq.s32.totalorder %s375_s14, 1 }
   0x9   : > { %p652_p4 = por %p40_p1, %p39_p0  ;;  %p376_p5 = scmp.ge.s32.totalorder %s598_s12, 1 }
   0xa   : > { %p657_p6 = por %p90_p3, %p39_p0  ;;  %p97_p7 = scmp.lt.s32.totalorder %s598_s12, 3 }
   0xb   : > { %s109_s19 = sshll.u32 %s770_s1, 4  ;;  %s600_s21 = smov [#allocation5]   ;;  %s110_s19 = int_to_ptr.hbm [resolvable:$true] %s109_s19 }
   0xc   : > { %p665_p8 = pnand %p376_p5, %p97_p7  ;;  %s111_s22 = sshll.u32 %s600_s21, 4  ;;  %s112_s22 = int_to_ptr.vmem [resolvable:$true] %s111_s22 }
   0xd   : > { %s675_s23 = sadd.s32 1, %s598_s12   ;;  %s26_s24 = sadd.s32 1, %s594_s11 }
   0xe   : > { %p401_p10 = pneg %p665_p8  ;;  %s23_s25 = ssub.s32 %s598_s12, %s675_s23 }
   0xf   : > { %p24_p12 = scmp.eq.s32.totalorder %s23_s25, 0  ;;  %p33_p13 = scmp.ne.s32.totalorder %s594_s11, %s590_s10 }
  0x10   : > { %p402_p11 = pnand %p401_p10, %p40_p1  ;;  %p34_p0 = scmp.eq.s32.totalorder %s598_s12, 0 }
  0x11   : > { %s684_s26 = scalar_select %p24_p12, %s594_s11, %s26_s24  }
  0x12   : > { %404 = dma.hbm_to_vmem [thread:$0]  (!%p402_p11), %s110_s19, 64, %s112_s22, [#allocation6]  }
  0x13   : > { %p688_p3 = por %p84_p2, %p33_p13  ;;  %p414_p5 = scmp.lt.s32.totalorder %s598_s12, 2 }
  0x14   : > { %s122_s28 = sand.u32 1, %s594_s11   ;;  %s391_s29 = sshll.u32 %s598_s12, 3 }
  0x15   : > { %p35_p7 = por %p34_p0, %p33_p13  ;;  %s379_s30 = sshll.u32 %s122_s28, 3 }
  0x16   : > { %s131_s5 = scalar_lea.hbm %s769_s0, %s391_s29  ;;  %s126_s7 = scalar_lea.vmem [#allocation2], %s379_s30 }
  0x17   : > { %s133_s6 = sshll.u32 %s131_s5, 4  ;;  %s135_s8 = sshll.u32 %s126_s7, 4  ;;  %s134_s6 = int_to_ptr.hbm [resolvable:$true] %s133_s6  ;;  %s136_s8 = int_to_ptr.vmem [resolvable:$true] %s135_s8 }
  0x18   : > { %p698_p10 = pnand %p414_p5, %p35_p7  ;;  %s123_s17 = scalar_lea.sflag [#allocation3], %s122_s28 }
  0x19   : > { %s498_s18 = sshra.s32 %s134_s6, 4  ;;  %s505_s24 = scalar_lea.hbm %s769_s0, 16  ;;  %s499_s18 = int_to_ptr.hbm [resolvable:$true] %s498_s18 }
  0x1a   : > { %s500_s19 = scalar_lea.hbm %s499_s18, 8  ;;  %p502_p11 = pneg %p698_p10 }
  0x1b   : > { %p501_p2 = scmp.ne.s32.totalorder %s499_s18, %s500_s19  ;;  %p506_p0 = scmp.lt.s32.totalorder %s499_s18, %s769_s0 }
  0x1c   : > { %p507_p5 = scmp.lt.s32.totalorder %s505_s24, %s500_s19 }
  0x1d   : > { %p503_p12 = pnand %p502_p11, %p501_p2 }
  0x1e   : > { %p508_p7 = por %p507_p5, %p506_p0 }
  0x1f   : > { %p504_p13 = pneg %p503_p12 }
  0x21   : > { %p509_p9 = pnand %p508_p7, %p504_p13 }
  0x23   : > { %512 = shalt.err (!%p509_p9)
}
  0x24   : > { %408 = dma.hbm_to_vmem [thread:$0]  (!%p698_p10), %s134_s6, 128, %s136_s8, %s123_s17  }
  0x25   : > { %144 = sbr.rel (%p665_p8) target bundleno = 606 (0x25e), region = 28  ;;  %s715_s28 = sand.u32 (!%p665_p8), 1, %s590_s10  }
  0x26   : > { %s383_s30 = sshll.u32 (!%p665_p8), %s715_s28, 3  ;;  %s147_s3 = scalar_lea.sflag (!%p665_p8), [#allocation3], %s715_s28 }
  0x27   : > { %s150_s4 = scalar_lea.vmem (!%p665_p8), [#allocation2], %s383_s30 }
  0x2a   : > { %573 = dma.done.wait (%p652_p4), %s147_s3, 128  }
  0x2b   : > { %575 = vsyncadd (%p652_p4), %s147_s3, 4294967168 }
  0x2c   : > { %577 = dma.done.wait (%p40_p1), [#allocation6], 64  }
  0x2d   : > { %579 = vsyncadd (%p40_p1), [#allocation6], 4294967232  ;;  %v729_v0 = vld [vmem:[%s150_s4] sm:$0xff]  ;;  %vm186_vm0 = vcmask 1043456   ;;  %v601_v12 = vmov 4.0   ;;  %vm207_vm3 = vcmask 3072  }
  0x2e   : > { %v179_v1 = vmul.f32 %v729_v0, %v729_v0  ;;  %v178_v18 = vld [vmem:[#allocation5] sm:$0xf]  ;;  %s602_s15 = smov 1   ;;  %s603_s20 = smov 127   ;;  %v605_v60 = vmov 0  }
  0x2f   : > { %s604_s5 = smov 126   ;;  %456 = vset.pattern.permute.xlu2 %v605_v60  ;;  %457 = vset.pattern.permute.xlu0 %v605_v60  ;;  %s392_s6 = sshll.u32 %s643_s13, 3 }
  0x30   : > { %181 = vst [vmem:[#allocation1] ss:$2 sm:$0xff] %v179_v1  ;;  %s290_s14 = scalar_lea.hbm %s771_s2, %s392_s6  ;;  %s176_s17 = scalar_lea.vmem [#allocation7], %s383_s30 }
  0x31   : > { %s292_s18 = sshll.u32 %s176_s17, 4  ;;  %s294_s19 = sshll.u32 %s290_s14, 4  ;;  %s293_s18 = int_to_ptr.vmem [resolvable:$true] %s292_s18  ;;  %s295_s19 = int_to_ptr.hbm [resolvable:$true] %s294_s19 }
  0x32   : > { %s279_s21 = scalar_lea.sflag [#allocation4], %s715_s28  ;;  %s542_s22 = sshra.s32 %s295_s19, 4  ;;  %s543_s22 = int_to_ptr.hbm [resolvable:$true] %s542_s22 }
  0x33   : > { %s544_s13 = scalar_lea.hbm %s543_s22, 8  ;;  %s548_s29 = scalar_lea.hbm %s771_s2, 16 }
  0x34   : > { %p545_p1 = scmp.ne.s32.totalorder %s543_s22, %s544_s13  ;;  %p549_p9 = scmp.lt.s32.totalorder %s543_s22, %s771_s2 }
  0x35   : > { %p550_p10 = scmp.lt.s32.totalorder %s548_s29, %s544_s13 }
  0x36   : > { %p546_p4 = pnand %p545_p1, %p688_p3 }
  0x37   : > { %v182_v2 = vld.sshfl [vmem:[#allocation1] sm:$0xff pattern:$0x75316420]  ;;  %v183_v3 = vld.sshfl [vmem:[#allocation1 + $0x8] sm:$0xff pattern:$0x75316420]  ;;  %p551_p2 = por %p550_p10, %p549_p9 }
  0x38   : > { %v187_v4 = vsel %vm186_vm0, %v182_v2, 0.0  ;;  %v188_v5 = vsel %vm186_vm0, %v183_v3, 0.0  ;;  %p547_p8 = pneg %p546_p4 }
  0x39   : > { %v189_v6 = vadd.f32 %v188_v5, %v187_v4  ;;  %v606_v4 = vmov 839922192  }
  0x3a   : > { %v272_v5 = vunpack.c.l.s4 %v606_v4  ;;  %p552_p11 = pnand %p551_p2, %p547_p8 }
  0x3b   : > { %190 = vadd.xlane.f32.xlu0 %v189_v6 }
  0x3c   : > { %v273_v6 = vunpack.c.0.s8 %v272_v5 }
  0xae   : > { %v191_v7 = vpop.xlane.xlu0 %190 }
  0xaf   : > { %v192_v8 = vadd.f32 1e-05, %v191_v7 }
  0xb1   : > { %458 = vrsqrt.f32 %v192_v8  ;;  %vm200_vm1 = vcmp.eq.f32.partialorder %v192_v8, inf  ;;  %v203_v19 = vand.u32 2147483648, %v192_v8  ;;  %vm202_vm2 = vcmp.eq.f32.partialorder %v192_v8, 0.0 }
  0xb2   : > { %460 = vrcp.f32 %v601_v12 }
  0xb7   : > { %v459_v9 = vpop.eup %458 }
  0xb8   : > { %v194_v10 = vmul.f32 %v459_v9, %v192_v8  ;;  %v461_v16 = vpop.eup %460 }
  0xb9   : > { %v216_v21 = vmul.f32 4.0, %v461_v16  ;;  %vm220_vm4 = vweird.f32 %v461_v16 }
  0xba   : > { %v195_v11 = vmul.f32 %v459_v9, %v194_v10 }
  0xbb   : > { %v217_v25 = vsub.f32 1.0, %v216_v21 }
  0xbc   : > { %v196_v13 = vmul.f32 0.5, %v195_v11 }
  0xbd   : > { %v218_v28 = vmul.f32 %v461_v16, %v217_v25 }
  0xbe   : > { %v197_v14 = vsub.f32 1.5, %v196_v13 }
  0xbf   : > { %v219_v31 = vadd.f32 %v461_v16, %v218_v28 }
  0xc0   : > { %v198_v15 = vmul.f32 %v459_v9, %v197_v14 }
  0xc1   : > { %v221_v34 = vsel %vm220_vm4, %v461_v16, %v219_v31 }
  0xc2   : > { %v199_v17 = vmul.f32 %v198_v15, %v192_v8 }
  0xc4   : > { %v201_v20 = vsel %vm200_vm1, %v192_v8, %v199_v17 }
  0xc5   : > { %v204_v22 = vsel %vm202_vm2, %v203_v19, %v201_v20 }
  0xc6   : > { %v205_v23 = vmul.f32 %v204_v22, %v178_v18 }
  0xc8   : > { %v206_v24 = vmul.f32 %v205_v23, %v205_v23 }
  0xca   : > { %v208_v26 = vsel %vm207_vm3, %v206_v24, 0.0 }
  0xcb   : > { %v209_v27 = vrot.slane %v208_v26, 4 }
  0xcd   : > { %v210_v29 = vadd.f32 %v209_v27, %v208_v26 }
  0xcf   : > { %v211_v30 = vrot.slane %v210_v29, 2 }
  0xd1   : > { %v212_v32 = vadd.f32 %v211_v30, %v210_v29 }
  0xd3   : > { %v213_v33 = vrot.slane %v212_v32, 1 }
  0xd5   : > { %v214_v35 = vadd.f32 %v213_v33, %v212_v32 }
  0xd7   : > { %v222_v36 = vmul.f32 %v221_v34, %v214_v35 }
  0xd9   : > { %v223_v37 = vadd.f32 1e-05, %v222_v36 }
  0xdb   : > { %462 = vrsqrt.f32 %v223_v37  ;;  %vm231_vm5 = vcmp.eq.f32.partialorder %v223_v37, inf  ;;  %v234_v45 = vand.u32 2147483648, %v223_v37  ;;  %vm233_vm6 = vcmp.eq.f32.partialorder %v223_v37, 0.0 }
  0xe1   : > { %v463_v38 = vpop.eup %462 }
  0xe2   : > { %v225_v39 = vmul.f32 %v463_v38, %v223_v37 }
  0xe4   : > { %v226_v40 = vmul.f32 %v463_v38, %v225_v39 }
  0xe6   : > { %v227_v41 = vmul.f32 0.5, %v226_v40 }
  0xe8   : > { %v228_v42 = vsub.f32 1.5, %v227_v41 }
  0xea   : > { %v229_v43 = vmul.f32 %v463_v38, %v228_v42 }
  0xec   : > { %v230_v44 = vmul.f32 %v229_v43, %v223_v37 }
  0xee   : > { %v232_v46 = vsel %vm231_vm5, %v223_v37, %v230_v44 }
  0xef   : > { %v235_v47 = vsel %vm233_vm6, %v234_v45, %v232_v46 }
  0xf0   : > { %237 = vrot.lane.b32.xlu0 %v235_v47, %s602_s15 }
 0x162   : > { %v238_v48 = vpop.permute.xlu0 %237 }
 0x163   : > { %464 = vrcp.f32 %v238_v48  ;;  %v251_v52 = vand.u32 2147483648, %v238_v48  ;;  %v249_v54 = vand.u32 2147483647, %v238_v48  ;;  %vm245_vm8 = vweird.f32 %v238_v48 }
 0x165   : > { %v252_v56 = vor.u32 1.1754944e-38, %v251_v52  ;;  %vm250_vm10 = vcmp.eq.f32.partialorder %v249_v54, 8.507059e+37 }
 0x169   : > { %v465_v49 = vpop.eup %464 }
 0x16a   : > { %v241_v50 = vmul.f32 %v465_v49, %v238_v48  ;;  %vm246_vm7 = vweird.f32 %v465_v49 }
 0x16b   : > { %vm247_vm9 = vmor %vm245_vm8, %vm246_vm7 }
 0x16c   : > { %v242_v51 = vsub.f32 1.0, %v241_v50 }
 0x16e   : > { %v243_v53 = vmul.f32 %v465_v49, %v242_v51 }
 0x170   : > { %v244_v55 = vadd.f32 %v465_v49, %v243_v53 }
 0x172   : > { %v248_v57 = vsel %vm247_vm9, %v465_v49, %v244_v55 }
 0x173   : > { %v253_v58 = vsel %vm250_vm10, %v252_v56, %v248_v57 }
 0x174   : > { %v254_v59 = vmul.f32 %v253_v58, %v178_v18 }
 0x176   : > { %256 = vrot.lane.b32.xlu1 %v254_v59, %s603_s20 }
 0x17e   : > { %261 = vrot.lane.b32.xlu1 %v178_v18, %s604_s5 }
 0x1e8   : > { %v257_v61 = vpop.permute.xlu1 %256 }
 0x1e9   : > { %v259_v62 = vmul.f32 %v257_v61, %v205_v23 }
 0x1f0   : > { %v262_v63 = vpop.permute.xlu1 %261 }
 0x1f1   : > { %v264_v1 = vadd.f32 %v262_v63, %v259_v62 }
 0x1f3   : > { %466 = vtanh.f32 %v264_v1 }
 0x1f9   : > { %v467_v2 = vpop.eup %466 }
 0x1fa   : > { %v266_v3 = vadd.f32 1.0, %v467_v2 }
 0x1fc   : > { %269 = vperm.xlu2 %456, %v266_v3  }
 0x256   : > { %v270_v7 = vpop.permute.xlu2 %269 }
 0x257   : > { %v274_v8 = vperm.slane %v270_v7, %v273_v6 }
 0x259   : > { %v276_v9 = vmul.f32 %v274_v8, %v729_v0 }
 0x25b   : > { %277 = vst [vmem:[%s176_s17] sm:$0xff] %v276_v9 }
 0x25c   : > { %555 = shalt.err (!%p552_p11)
}
 0x25d   : > { %399 = dma.vmem_to_hbm [thread:$0]  (%p688_p3), %s293_s18, 128, %s295_s19, %s279_s21  }
 0x25e PF: > { %s306_s28 = sand.u32 1, %s586_s9   ;;  %p777_p12 = scmp.ge.s32.totalorder %s598_s12, 2 }
 0x25f   : > { %s307_s4 = scalar_lea.sflag [#allocation4], %s306_s28 }
 0x260   : > { %p410_p13 = pnand %p777_p12, %p657_p6 }
 0x262   : > { %p411_p0 = pneg %p410_p13 }
 0x264   : > { %581 = dma.done.wait (%p411_p0), %s307_s4, 128  }
 0x265   : > { %583 = vsyncadd (%p411_p0), %s307_s4, 4294967168  ;;  %p16_p5 = scmp.ge.s32.totalorder %s675_s23, 4   ;;  %s778_s9 = smov %s590_s10 }
 0x266   : > { %s779_s10 = smov %s594_s11  ;;  %s780_s11 = smov %s684_s26 }
 0x267   : > { %s781_s12 = smov %s675_s23  ;;  %18 = sbr.rel (!%p16_p5) target bundleno = 6 (0x6), region = 77 }
 0x26c   :  { %313 = vsyncpa [#allocation3], 1 }
 0x26d   :  { %315 = vsyncpa [#allocation3 + $0x1], 1 }
 0x26e   :  { %316 = vsyncpa [#allocation6], 1 }
 0x26f   :  { %317 = vsyncpa [#allocation4], 1 }
 0x270   :  { %319 = vsyncpa [#allocation4 + $0x1], 1 }

</bundles_post_ra>
